<compile_context>
chip_gen: v7x
topology: tpu7x:2x2x1
jax: 0.10.0
libtpu: 0.0.40
codegen_flags: <defaults>
</compile_context>

<pallas_src>
import jax
import jax.numpy as jnp
from jax.experimental import pallas as pl
from jax.experimental.pallas import tpu as pltpu


def gine_scatter_mlp_kernel(off_ref, nblk_ref,            # scalar prefetch (SMEM)
                            msg_ref, dst_ref,              # E-tiled inputs
                            w1_ref, b1_ref, w2_ref, b2_ref,  # resident weights
                            out_ref, acc_ref):
    n = pl.program_id(0)
    e = pl.program_id(1)
    TN = acc_ref.shape[0]
    TE = msg_ref.shape[0]
    n_base = n * TN

    @pl.when(e == 0)
    def _init():
        acc_ref[...] = jnp.zeros_like(acc_ref)

    # Scatter-add this edge block into the node-tile accumulator.  Skip blocks
    # past this tile's edge group (the clamped index_map may have re-fetched
    # an already-processed block for padding steps).
    @pl.when(e < nblk_ref[n])
    def _accumulate():
        dst = dst_ref[...]                                                    # [1, TE] i32
        row_ids = n_base + jax.lax.broadcasted_iota(jnp.int32, (TN, TE), 0)
        dst_oh = (row_ids == dst).astype(jnp.bfloat16)                        # [TN, TE]
        acc_ref[...] += jnp.dot(dst_oh, msg_ref[...],
                                preferred_element_type=jnp.float32)           # [TN, Fp]

    # Finalize: node MLP (Linear -> ReLU -> Linear), bf16 operands / f32 accum.
    @pl.when(e == pl.num_programs(1) - 1)
    def _finalize():
        h1 = jnp.dot(acc_ref[...].astype(jnp.bfloat16), w1_ref[...],
                     preferred_element_type=jnp.float32) + b1_ref[...]
        h1 = jnp.maximum(h1, 0.0)
        out = jnp.dot(h1.astype(jnp.bfloat16), w2_ref[...],
                      preferred_element_type=jnp.float32) + b2_ref[...]
        out_ref[...] = out.astype(out_ref.dtype)                              # lane-dense store


def _round_up(x, m):
    return ((x + m - 1) // m) * m


def gine_layer_pallas(H, edge_index, edge_attr, params, *, tile_n=256, tile_e=512):
    """H: [N, F_in] f32, edge_index: [2, E] int, edge_attr: [E, D_e].

    tile_n must be a multiple of 8, tile_e a multiple of 128.
    Not jittable end-to-end: the grid extent depends on the edge distribution.
    """
    assert tile_n % 8 == 0 and tile_e % 128 == 0
    f32, bf16, i32 = jnp.float32, jnp.bfloat16, jnp.int32
    N, F_in = H.shape
    E, D_e = edge_attr.shape
    F_out = params["w2"].shape[1]

    LANE = 128
    F_in_p = _round_up(F_in, LANE)
    F_out_p = _round_up(F_out, LANE)
    TN = min(tile_n, _round_up(N, 8))
    N_p = _round_up(N, TN)
    n_tiles = N_p // TN
    TE = min(tile_e, _round_up(E, LANE))
    E_p = _round_up(E, TE)
    last_blk = E_p // TE - 1

    src = edge_index[0].astype(i32)
    dst = edge_index[1].astype(i32)

    # ---- pass 1 (wrapper, plain XLA): gather + edge MLP, computed exactly once ----
    edge_msg = edge_attr.astype(f32) @ params["we"].astype(f32) + params["be"].astype(f32)
    messages = H.astype(f32)[src] + edge_msg                                  # [E, F_in] f32

    # ---- group edges by destination node-tile (sorted -> contiguous groups) ----
    order = jnp.argsort(dst)                      # stable
    dst_s = dst[order]
    msgs_s = messages[order]
    tile_ids = dst_s // TN
    counts = jnp.bincount(tile_ids, length=n_tiles).astype(i32)
    starts = (jnp.cumsum(counts) - counts).astype(i32)       # exclusive cumsum
    ends = starts + counts
    blk_start = (starts // TE).astype(i32)                    # first edge-block of each group
    blk_end = jnp.where(counts > 0, (ends - 1) // TE + 1, blk_start).astype(i32)
    nblk = (blk_end - blk_start).astype(i32)                   # edge-blocks per node tile
    max_nblk = max(int(jnp.max(nblk)), 1)                      # host value -> static grid extent

    # ---- padded, lane-dense operands ----
    msgs_p = jnp.zeros((E_p, F_in_p), bf16).at[:E, :F_in].set(msgs_s.astype(bf16))
    dst_p = jnp.full((1, E_p), -1, i32).at[0, :E].set(dst_s)   # padded edges never match a row
    w1 = jnp.zeros((F_in_p, F_out_p), bf16).at[:F_in, :F_out].set(params["w1"].astype(bf16))
    b1 = jnp.zeros((1, F_out_p), f32).at[0, :F_out].set(params["b1"].astype(f32))
    w2 = jnp.zeros((F_out_p, F_out_p), bf16).at[:F_out, :F_out].set(params["w2"].astype(bf16))
    b2 = jnp.zeros((1, F_out_p), f32).at[0, :F_out].set(params["b2"].astype(f32))

    # index maps receive (n, e, *scalar_prefetch_refs)
    const = lambda n, e, off, nb: (0, 0)

    def msg_map(n, e, off, nb):
        return (jnp.minimum(off[n] + e, last_blk), 0)

    def dst_map(n, e, off, nb):
        return (0, jnp.minimum(off[n] + e, last_blk))

    in_specs = [
        pl.BlockSpec((TE, F_in_p), msg_map),            # messages (E-tiled, per-node-tile group)
        pl.BlockSpec((1, TE), dst_map),                 # dst (lane-dense, E-tiled)
        pl.BlockSpec((F_in_p, F_out_p), const),         # w1 (resident, tiny)
        pl.BlockSpec((1, F_out_p), const),              # b1
        pl.BlockSpec((F_out_p, F_out_p), const),        # w2
        pl.BlockSpec((1, F_out_p), const),              # b2
    ]
    out_specs = pl.BlockSpec((TN, F_out_p), lambda n, e, off, nb: (n, 0))

    out_p = pl.pallas_call(
        gine_scatter_mlp_kernel,
        out_shape=jax.ShapeDtypeStruct((N_p, F_out_p), f32),
        grid_spec=pltpu.PrefetchScalarGridSpec(
            num_scalar_prefetch=2,
            grid=(n_tiles, max_nblk),
            in_specs=in_specs,
            out_specs=out_specs,
            scratch_shapes=[pltpu.VMEM((TN, F_in_p), f32)],   # f32 aggregation accumulator
        ),
        compiler_params=pltpu.CompilerParams(
            dimension_semantics=("parallel", "arbitrary"),
            vmem_limit_bytes=32 * 1024 * 1024),
    )(blk_start, nblk, msgs_p, dst_p, w1, b1, w2, b2)

    return out_p[:N, :F_out]


def gine_layer_ref(H, edge_index, edge_attr, params, *, match_kernel_rounding=False):
    """Pure-JAX reference matching the PyTorch forward (optionally mirroring the
    kernel's bf16-operand / f32-accumulate rounding)."""
    f32, bf16 = jnp.float32, jnp.bfloat16
    edge_messages = edge_attr.astype(f32) @ params["we"] + params["be"]
    messages = H.astype(f32)[edge_index[0]] + edge_messages
    if match_kernel_rounding:
        messages = messages.astype(bf16).astype(f32)
    aggregated = jax.ops.segment_sum(messages, edge_index[1], num_segments=H.shape[0])
    if match_kernel_rounding:
        w1 = params["w1"].astype(bf16).astype(f32)
        w2 = params["w2"].astype(bf16).astype(f32)
        agg = aggregated.astype(bf16).astype(f32)
        h1 = jnp.maximum(agg @ w1 + params["b1"], 0.0)
        h1 = h1.astype(bf16).astype(f32)
        return h1 @ w2 + params["b2"]
    h1 = jnp.maximum(aggregated @ params["w1"] + params["b1"], 0.0)
    return h1 @ params["w2"] + params["b2"]


def init_params(key, in_features, out_features, edge_attr_dim):
    ks = jax.random.split(key, 6)
    scale = 0.1
    # stored pre-transposed as [in, out] for row-major matmuls
    return {
        "we": scale * jax.random.normal(ks[0], (edge_attr_dim, in_features), jnp.float32),
        "be": scale * jax.random.normal(ks[1], (in_features,), jnp.float32),
        "w1": scale * jax.random.normal(ks[2], (in_features, out_features), jnp.float32),
        "b1": scale * jax.random.normal(ks[3], (out_features,), jnp.float32),
        "w2": scale * jax.random.normal(ks[4], (out_features, out_features), jnp.float32),
        "b2": scale * jax.random.normal(ks[5], (out_features,), jnp.float32),
    }


if __name__ == "__main__":
    key = jax.random.PRNGKey(0)
    # small shapes, tiles chosen so both grid axes have >1 tile (tile_n=32, tile_e=128)
    N, E = 64, 300
    in_features, out_features, edge_attr_dim = 16, 32, 8

    k_h, k_ea, k_src, k_dst, k_p = jax.random.split(key, 5)
    H = jax.random.normal(k_h, (N, in_features), jnp.float32)
    edge_attr = jax.random.normal(k_ea, (E, edge_attr_dim), jnp.float32)
    src = jax.random.randint(k_src, (E,), 0, N, jnp.int32)
    dst = jax.random.randint(k_dst, (E,), 0, N, jnp.int32)
    edge_index = jnp.stack([src, dst], axis=0)

    params = init_params(k_p, in_features, out_features, edge_attr_dim)

    out = gine_layer_pallas(H, edge_index, edge_attr, params, tile_n=32, tile_e=128)
    out = jax.block_until_ready(out)
    assert out.shape == (N, out_features)

    # tight check vs. a reference applying the same bf16 operand rounding
    ref_match = gine_layer_ref(H, edge_index, edge_attr, params, match_kernel_rounding=True)
    assert jnp.allclose(out, ref_match, atol=5e-3, rtol=5e-3), "mismatch vs bf16-matched reference"

    # loose check vs. the pure-f32 PyTorch-equivalent forward
    ref = gine_layer_ref(H, edge_index, edge_attr, params)
    assert jnp.allclose(out, ref, atol=5e-2, rtol=5e-2), "mismatch vs f32 reference"

    print("KERNEL_OK")
</pallas_src>

<mosaic_0001>
module attributes {stable_mosaic.version = 11 : i64} {
  func.func @gine_scatter_mlp_kernel(%arg0: i32, %arg1: i32, %arg2: memref<2xi32, #tpu.memory_space<smem>>, %arg3: memref<2xi32, #tpu.memory_space<smem>>, %arg4: memref<128x128xbf16, #tpu.memory_space<vmem>>, %arg5: memref<1x128xi32, #tpu.memory_space<vmem>>, %arg6: memref<128x128xbf16, #tpu.memory_space<vmem>>, %arg7: memref<1x128xf32, #tpu.memory_space<vmem>>, %arg8: memref<128x128xbf16, #tpu.memory_space<vmem>>, %arg9: memref<1x128xf32, #tpu.memory_space<vmem>>, %arg10: memref<32x128xf32, #tpu.memory_space<vmem>>, %arg11: memref<32x128xf32, #tpu.memory_space<vmem>>) attributes {dimension_semantics = [#tpu.dimension_semantics<parallel>, #tpu.dimension_semantics<arbitrary>], iteration_bounds = array<i64: 2, 2>, scalar_prefetch = 2 : i64, scratch_operands = 1 : i64, tpu.core_type = #tpu.core_type<tc>, window_params = [{transform_indices = @transform_0, window_bounds = array<i64: 128, 128>}, {transform_indices = @transform_1, window_bounds = array<i64: 1, 128>}, {pipeline_mode = #tpu.pipeline_mode<synchronous>, transform_indices = @transform_2, window_bounds = array<i64: 128, 128>}, {pipeline_mode = #tpu.pipeline_mode<synchronous>, transform_indices = @transform_3, window_bounds = array<i64: 1, 128>}, {pipeline_mode = #tpu.pipeline_mode<synchronous>, transform_indices = @transform_4, window_bounds = array<i64: 128, 128>}, {pipeline_mode = #tpu.pipeline_mode<synchronous>, transform_indices = @transform_5, window_bounds = array<i64: 1, 128>}, {transform_indices = @transform_6, window_bounds = array<i64: 32, 128>}]} {
    %c32_i32 = arith.constant 32 : i32
    %0 = arith.muli %arg0, %c32_i32 : i32
    %c0_i32 = arith.constant 0 : i32
    %1 = arith.cmpi eq, %arg1, %c0_i32 : i32
    %2 = arith.extui %1 : i1 to i32
    %c0_i32_0 = arith.constant 0 : i32
    %3 = arith.cmpi ne, %2, %c0_i32_0 : i32
    scf.if %3 {
      %cst = arith.constant 0.000000e+00 : f32
      %12 = vector.broadcast %cst : f32 to vector<32x128xf32>
      %c0 = arith.constant 0 : index
      %c0_3 = arith.constant 0 : index
      %13 = vector.load %arg11[%c0, %c0_3] : memref<32x128xf32, #tpu.memory_space<vmem>>, vector<32x128xf32>
      tpu.vector_store %arg11[%c0, %c0_3], %12 {strides = array<i32>} : memref<32x128xf32, #tpu.memory_space<vmem>>, vector<32x128xf32>,
    } else {
    }
    %4 = arith.index_cast %arg0 : i32 to index
    %5 = memref.load %arg3[%4] : memref<2xi32, #tpu.memory_space<smem>>
    %6 = arith.cmpi slt, %arg1, %5 : i32
    %7 = arith.extui %6 : i1 to i32
    %c0_i32_1 = arith.constant 0 : i32
    %8 = arith.cmpi ne, %7, %c0_i32_1 : i32
    scf.if %8 {
      %c0 = arith.constant 0 : index
      %c0_3 = arith.constant 0 : index
      %12 = vector.load %arg5[%c0, %c0_3] : memref<1x128xi32, #tpu.memory_space<vmem>>, vector<1x128xi32>
      %13 = tpu.iota {dimensions = array<i32: 0>} : vector<32x128xi32>
      %14 = vector.broadcast %0 : i32 to vector<32x128xi32>
      %15 = arith.addi %14, %13 : vector<32x128xi32>
      %16 = vector.broadcast %12 : vector<1x128xi32> to vector<32x128xi32>
      %17 = arith.cmpi eq, %15, %16 : vector<32x128xi32>
      %18 = arith.extui %17 : vector<32x128xi1> to vector<32x128xi32>
      %19 = arith.sitofp %18 : vector<32x128xi32> to vector<32x128xf32>
      %20 = arith.truncf %19 : vector<32x128xf32> to vector<32x128xbf16>
      %c0_4 = arith.constant 0 : index
      %c0_5 = arith.constant 0 : index
      %21 = vector.load %arg11[%c0_4, %c0_5] : memref<32x128xf32, #tpu.memory_space<vmem>>, vector<32x128xf32>
      %c0_6 = arith.constant 0 : index
      %c0_7 = arith.constant 0 : index
      %22 = vector.load %arg4[%c0_6, %c0_7] : memref<128x128xbf16, #tpu.memory_space<vmem>>, vector<128x128xbf16>
      %cst = arith.constant dense<0.000000e+00> : vector<32x128xf32>
      %23 = tpu.matmul %20, %22, %cst {dimension_numbers = #tpu.dot_dimension_numbers<[1], [0], [0], [1], [0, 0, 1, 1], [], []>} : vector<32x128xbf16>, vector<128x128xbf16>, vector<32x128xf32> -> vector<32x128xf32>
      %24 = arith.addf %21, %23 : vector<32x128xf32>
      %c0_8 = arith.constant 0 : index
      %c0_9 = arith.constant 0 : index
      %25 = vector.load %arg11[%c0_8, %c0_9] : memref<32x128xf32, #tpu.memory_space<vmem>>, vector<32x128xf32>
      tpu.vector_store %arg11[%c0_8, %c0_9], %24 {strides = array<i32>} : memref<32x128xf32, #tpu.memory_space<vmem>>, vector<32x128xf32>,
    } else {
    }
    %c1_i32 = arith.constant 1 : i32
    %9 = arith.cmpi eq, %arg1, %c1_i32 : i32
    %10 = arith.extui %9 : i1 to i32
    %c0_i32_2 = arith.constant 0 : i32
    %11 = arith.cmpi ne, %10, %c0_i32_2 : i32
    scf.if %11 {
      %c0 = arith.constant 0 : index
      %c0_3 = arith.constant 0 : index
      %12 = vector.load %arg11[%c0, %c0_3] : memref<32x128xf32, #tpu.memory_space<vmem>>, vector<32x128xf32>
      %13 = arith.truncf %12 : vector<32x128xf32> to vector<32x128xbf16>
      %c0_4 = arith.constant 0 : index
      %c0_5 = arith.constant 0 : index
      %14 = vector.load %arg6[%c0_4, %c0_5] : memref<128x128xbf16, #tpu.memory_space<vmem>>, vector<128x128xbf16>
      %cst = arith.constant dense<0.000000e+00> : vector<32x128xf32>
      %15 = tpu.matmul %13, %14, %cst {dimension_numbers = #tpu.dot_dimension_numbers<[1], [0], [0], [1], [0, 0, 1, 1], [], []>} : vector<32x128xbf16>, vector<128x128xbf16>, vector<32x128xf32> -> vector<32x128xf32>
      %c0_6 = arith.constant 0 : index
      %c0_7 = arith.constant 0 : index
      %16 = vector.load %arg7[%c0_6, %c0_7] : memref<1x128xf32, #tpu.memory_space<vmem>>, vector<1x128xf32>
      %17 = vector.broadcast %16 : vector<1x128xf32> to vector<32x128xf32>
      %18 = arith.addf %15, %17 : vector<32x128xf32>
      %cst_8 = arith.constant 0.000000e+00 : f32
      %19 = vector.broadcast %cst_8 : f32 to vector<32x128xf32>
      %20 = arith.maximumf %18, %19 : vector<32x128xf32>
      %21 = arith.truncf %20 : vector<32x128xf32> to vector<32x128xbf16>
      %c0_9 = arith.constant 0 : index
      %c0_10 = arith.constant 0 : index
      %22 = vector.load %arg8[%c0_9, %c0_10] : memref<128x128xbf16, #tpu.memory_space<vmem>>, vector<128x128xbf16>
      %cst_11 = arith.constant dense<0.000000e+00> : vector<32x128xf32>
      %23 = tpu.matmul %21, %22, %cst_11 {dimension_numbers = #tpu.dot_dimension_numbers<[1], [0], [0], [1], [0, 0, 1, 1], [], []>} : vector<32x128xbf16>, vector<128x128xbf16>, vector<32x128xf32> -> vector<32x128xf32>
      %c0_12 = arith.constant 0 : index
      %c0_13 = arith.constant 0 : index
      %24 = vector.load %arg9[%c0_12, %c0_13] : memref<1x128xf32, #tpu.memory_space<vmem>>, vector<1x128xf32>
      %25 = vector.broadcast %24 : vector<1x128xf32> to vector<32x128xf32>
      %26 = arith.addf %23, %25 : vector<32x128xf32>
      %c0_14 = arith.constant 0 : index
      %c0_15 = arith.constant 0 : index
      %27 = vector.load %arg10[%c0_14, %c0_15] : memref<32x128xf32, #tpu.memory_space<vmem>>, vector<32x128xf32>
      tpu.vector_store %arg10[%c0_14, %c0_15], %26 {strides = array<i32>} : memref<32x128xf32, #tpu.memory_space<vmem>>, vector<32x128xf32>,
    } else {
    }
    return
  }
  func.func @transform_0(%arg0: i32, %arg1: i32, %arg2: memref<2xi32, #tpu.memory_space<smem>>, %arg3: memref<2xi32, #tpu.memory_space<smem>>) -> (i32, i32) {
    %0 = arith.index_cast %arg0 : i32 to index
    %1 = memref.load %arg2[%0] : memref<2xi32, #tpu.memory_space<smem>>
    %2 = arith.addi %1, %arg1 : i32
    %c2_i32 = arith.constant 2 : i32
    %3 = arith.minsi %2, %c2_i32 : i32
    %c0_i32 = arith.constant 0 : i32
    %c0_i32_0 = arith.constant 0 : i32
    return %3, %c0_i32 : i32, i32
  }
  func.func @transform_1(%arg0: i32, %arg1: i32, %arg2: memref<2xi32, #tpu.memory_space<smem>>, %arg3: memref<2xi32, #tpu.memory_space<smem>>) -> (i32, i32) {
    %0 = arith.index_cast %arg0 : i32 to index
    %1 = memref.load %arg2[%0] : memref<2xi32, #tpu.memory_space<smem>>
    %2 = arith.addi %1, %arg1 : i32
    %c2_i32 = arith.constant 2 : i32
    %3 = arith.minsi %2, %c2_i32 : i32
    %c0_i32 = arith.constant 0 : i32
    %c0_i32_0 = arith.constant 0 : i32
    return %c0_i32, %3 : i32, i32
  }
  func.func @transform_2(%arg0: i32, %arg1: i32, %arg2: memref<2xi32, #tpu.memory_space<smem>>, %arg3: memref<2xi32, #tpu.memory_space<smem>>) -> (i32, i32) {
    %c0_i32 = arith.constant 0 : i32
    %c0_i32_0 = arith.constant 0 : i32
    %c0_i32_1 = arith.constant 0 : i32
    return %c0_i32, %c0_i32_0 : i32, i32
  }
  func.func @transform_3(%arg0: i32, %arg1: i32, %arg2: memref<2xi32, #tpu.memory_space<smem>>, %arg3: memref<2xi32, #tpu.memory_space<smem>>) -> (i32, i32) {
    %c0_i32 = arith.constant 0 : i32
    %c0_i32_0 = arith.constant 0 : i32
    %c0_i32_1 = arith.constant 0 : i32
    return %c0_i32, %c0_i32_0 : i32, i32
  }
  func.func @transform_4(%arg0: i32, %arg1: i32, %arg2: memref<2xi32, #tpu.memory_space<smem>>, %arg3: memref<2xi32, #tpu.memory_space<smem>>) -> (i32, i32) {
    %c0_i32 = arith.constant 0 : i32
    %c0_i32_0 = arith.constant 0 : i32
    %c0_i32_1 = arith.constant 0 : i32
    return %c0_i32, %c0_i32_0 : i32, i32
  }
  func.func @transform_5(%arg0: i32, %arg1: i32, %arg2: memref<2xi32, #tpu.memory_space<smem>>, %arg3: memref<2xi32, #tpu.memory_space<smem>>) -> (i32, i32) {
    %c0_i32 = arith.constant 0 : i32
    %c0_i32_0 = arith.constant 0 : i32
    %c0_i32_1 = arith.constant 0 : i32
    return %c0_i32, %c0_i32_0 : i32, i32
  }
  func.func @transform_6(%arg0: i32, %arg1: i32, %arg2: memref<2xi32, #tpu.memory_space<smem>>, %arg3: memref<2xi32, #tpu.memory_space<smem>>) -> (i32, i32) {
    %c0_i32 = arith.constant 0 : i32
    %c0_i32_0 = arith.constant 0 : i32
    return %arg0, %c0_i32 : i32, i32
  }
}

</mosaic_0001>

<bundles_post_ra>
// kernel: tpu_custom_call.1
= control target key start
LH: loop header
LB: loop body
LE: loop exit
PB: predicated region body
PF: predicated region fallthrough
CT: control target
= control target key end

     0   :  { %s1912_s0 = inlined_call_operand.hbm [shape: s32[2], index: 0, kind: input, shape index: {}]   ;;  %s1913_s2 = inlined_call_operand.hbm [shape: bf16[384,128], index: 2, kind: input, shape index: {}]   ;;  %s1914_s3 = inlined_call_operand.vmem [shape: s32[1,384], index: 3, kind: input, shape index: {}]   ;;  %s1915_s4 = inlined_call_operand.hbm [shape: bf16[128,128], index: 4, kind: input, shape index: {}]   ;;  %s1916_s5 = inlined_call_operand.vmem [shape: f32[1,128], index: 5, kind: input, shape index: {}]   ;;  %s1917_s6 = inlined_call_operand.hbm [shape: bf16[128,128], index: 6, kind: input, shape index: {}]   ;;  %s1918_s7 = inlined_call_operand.vmem [shape: f32[1,128], index: 7, kind: input, shape index: {}]   ;;  %s1919_s8 = inlined_call_operand.hbm [shape: f32[64,128], index: 8, kind: output, shape index: {}]   ;;  %s1920_s1 = inlined_call_operand.vmem [shape: s32[2], index: 1, kind: input, shape index: {}]  }
   0x1   :  { %1936 = sst [smem:[#allocation25_spill]] %s1915_s4  ;;  %s1248_s29 = scalar_lea.hbm %s1912_s0, 16 }
   0x2   :  { %1937 = sst [smem:[#allocation26_spill]] %s1917_s6  ;;  %p1249_p0 = scmp.ne.s32.totalorder %s1912_s0, %s1248_s29 }
   0x3   :  { %1938 = sst [smem:[#allocation27_spill]] %s1918_s7  ;;  %p1252_p1 = scmp.lt.u32.totalorder %s1248_s29, %s1912_s0 }
   0x4   :  { %1939 = sst [smem:[#allocation28_spill]] %s1919_s8 }
   0x5   :  { %p1254_p2 = pnand %p1252_p1, %p1249_p0 }
   0x7   :  { %1257 = shalt.err (!%p1254_p2)  }
   0x8   :  { %s1486_s12 = smov [#allocation4]   ;;  %s15_s17 = sshll.u32 %s1920_s1, 4  ;;  %s16_s17 = int_to_ptr.vmem [resolvable:$true] %s15_s17 }
   0x9   :  { %14 = dma.hbm_to_smem %s1912_s0, 16, %s1486_s12, [#allocation3] }
   0xa   :  { %s1258_s18 = scalar_lea.vmem %s16_s17, 16  ;;  %p1263_p4 = scmp.lt.s32.totalorder %s16_s17, %s16_s17 }
   0xb   :  { %p1259_p3 = scmp.ne.s32.totalorder %s16_s17, %s1258_s18  ;;  %p1264_p5 = scmp.lt.s32.totalorder %s1258_s18, %s1258_s18 }
   0xd   :  { %p1265_p6 = por %p1264_p5, %p1263_p4 }
   0xf   :  { %p1266_p7 = pnand %p1265_p6, %p1259_p3 }
  0x11   :  { %1269 = shalt.err (!%p1266_p7)  }
  0x12   :  { %s1487_s19 = smov [#allocation5]  }
  0x13   :  { %18 = dma.vmem_to_smem %s16_s17, 16, %s1487_s19, [#allocation3] }
  0x14   :  { %1428 = dma.done.wait [#allocation3], 32 }
  0x15   :  { %1429 = vsyncadd [#allocation3], 4294967264 }
  0x16   :  { %20 = sfence }
  0x17   :  { %21 = vsyncpa [#allocation7], 0 }
  0x18   :  { %23 = vsyncpa [#allocation7 + $0x1], 0 }
  0x19   :  { %24 = vsyncpa [#allocation10], 0 }
  0x1a   :  { %25 = vsyncpa [#allocation8], 0 }
  0x1b   :  { %27 = vsyncpa [#allocation8 + $0x1], 0  ;;  %s1558_s0 = smov 0   ;;  %s1560_s1 = smov 0  }
  0x1c   :  { %s1562_s20 = smov 0   ;;  %s1564_s21 = smov 0  }
  0x1d   :  { %s1566_s22 = smov 0   ;;  %s1568_s23 = smov 0  }
  0x1e   :  { %s1570_s24 = smov 0   ;;  %s1572_s25 = smov 0  }
  0x1f   :  { %s1574_s26 = smov 0   ;;  %s1576_s27 = smov 0  }
  0x20   :  { %s1578_s28 = smov 0  }
  0x21 LB: > { %1940 = sst [smem:[#allocation19_spill]] %s1444_s0  ;;  %s936_s29 = sadd.s32 4294967295, %s1484_s28   ;;  %s1484_s28 = sphi %s1578_s28, %s33_s28   ;;  %s1480_s27 = sphi %s1576_s27, %s1970_s27   ;;  %s1476_s26 = sphi %s1574_s26, %s1978_s26   ;;  %s1472_s25 = sphi %s1572_s25, %s1968_s25   ;;  %s1468_s24 = sphi %s1570_s24, %s1977_s24   ;;  %s1464_s23 = sphi %s1568_s23, %s1976_s23   ;;  %s1460_s22 = sphi %s1566_s22, %s1975_s22   ;;  %s1456_s21 = sphi %s1564_s21, %s1974_s21   ;;  %s1452_s20 = sphi %s1562_s20, %s1973_s20   ;;  %s1448_s1 = sphi %s1560_s1, %s1972_s1   ;;  %s1444_s0 = sphi %s1558_s0, %s1971_s0  }
  0x22   : > { %1941 = sst [smem:[#allocation20_spill]] %s1480_s27  ;;  %s937_s30 = sadd.s32 4294967294, %s1484_s28  }
  0x23   : > { %p73_p8 = scmp.ne.s32.totalorder %s1460_s22, %s1456_s21  ;;  %p1614_p9 = scmp.eq.s32.totalorder %s936_s29, 0 }
  0x24   : > { %p214_p10 = scmp.ne.s32.totalorder %s1452_s20, %s1448_s1  ;;  %p215_p12 = scmp.eq.s32.totalorder %s936_s29, 3 }
  0x25   : > { %s1942_s9 = scalar_select %p1614_p9, 1, 0 }
  0x26   : > { %p1622_p11 = por %p1614_p9, %p73_p8  ;;  %p220_p13 = scmp.ne.s32.totalorder %s1448_s1, %s1444_s0 }
  0x27   : > { %p221_p0 = scmp.eq.s32.totalorder %s937_s30, 3  ;;  %p1628_p1 = por %p215_p12, %p214_p10 }
  0x28   : > { %s1943_s10 = scalar_select %p1622_p11, 1, 0 }
  0x29   : > { %s1944_s11 = scalar_select %p1628_p1, 1, 0 }
  0x2a   : > { %p938_p2 = scmp.ge.s32.totalorder %s1484_s28, 1  ;;  %p1633_p3 = por %p221_p0, %p220_p13 }
  0x2b   : > { %1945 = sst [smem:[#allocation21_spill]] %s1944_s11  ;;  %p228_p4 = scmp.lt.s32.totalorder %s1484_s28, 5 }
  0x2c   : > { %s1946_s12 = scalar_select %p1633_p3, 1, 0 }
  0x2d   : > { %p1638_p5 = pnand %p938_p2, %p228_p4  ;;  %s1488_s14 = smov [#allocation9]  }
  0x2e   : > { %1947 = sst [smem:[#allocation22_spill]] %s1946_s12  ;;  %s240_s15 = sshll.u32 %s1488_s14, 4  ;;  %s241_s15 = int_to_ptr.vmem [resolvable:$true] %s240_s15 }
  0x2f   : > { %s1948_s13 = scalar_select %p1638_p5, 1, 0 }
  0x30   : > { %p1103_p6 = pneg %p1638_p5  ;;  %s1489_s17 = smov [#allocation11]  }
  0x31   : > { %s256_s18 = sshll.u32 %s1489_s17, 4  ;;  %s1950_s4 = sld [smem:[#allocation25_spill]]  ;;  %s1650_s18 = int_to_ptr.vmem [resolvable:$true] %s256_s18 }
  0x32   : > { %p1646_p7 = pnand %p1103_p6, %p1614_p9 }
  0x34   : > { %p1272_p10 = pneg %p1646_p7 }
  0x37   : > { %s1270_s29 = scalar_lea.hbm %s1950_s4, 1024 }
  0x38   : > { %p1271_p8 = scmp.ne.s32.totalorder %s1950_s4, %s1270_s29  ;;  %p1277_p0 = scmp.lt.u32.totalorder %s1270_s29, %s1950_s4 }
  0x3a   : > { %p1273_p12 = pnand %p1272_p10, %p1271_p8 }
  0x3c   : > { %p1274_p13 = pneg %p1273_p12 }
  0x3e   : > { %p1279_p2 = pnand %p1277_p0, %p1274_p13 }
  0x40   : > { %1282 = shalt.err (!%p1279_p2)
}
  0x41   : > { %s1283_s17 = scalar_lea.vmem %s241_s15, 1024  ;;  %p1291_p1 = scmp.lt.s32.totalorder %s241_s15, %s241_s15 }
  0x42   : > { %p1284_p4 = scmp.ne.s32.totalorder %s241_s15, %s1283_s17  ;;  %p1292_p9 = scmp.lt.s32.totalorder %s1283_s17, %s1283_s17 }
  0x44   : > { %p1286_p6 = pnand %p1284_p4, %p1272_p10  ;;  %p1293_p11 = por %p1292_p9, %p1291_p1 }
  0x46   : > { %p1287_p3 = pneg %p1286_p6 }
  0x48   : > { %p1294_p5 = pnand %p1293_p11, %p1287_p3 }
  0x4a   : > { %1297 = shalt.err (!%p1294_p5)
}
  0x4b   : > { %s1931_s19 = smov 64   ;;  %s1932_s21 = smov 4  }
  0x4c   : > { %1106 = dma.hbm_to_vmem [thread:$0]  (!%p1646_p7), %s1950_s4, 1024, %s241_s15, [#allocation10], %s1931_s19, %s1931_s19, %s1932_s21  }
  0x4d   : > { %s1951_s6 = sld [smem:[#allocation26_spill]] }
  0x53   : > { %s1298_s14 = scalar_lea.hbm %s1951_s6, 1024 }
  0x54   : > { %p1299_p9 = scmp.ne.s32.totalorder %s1951_s6, %s1298_s14  ;;  %p1305_p3 = scmp.lt.u32.totalorder %s1298_s14, %s1951_s6 }
  0x56   : > { %p1301_p11 = pnand %p1299_p9, %p1272_p10 }
  0x58   : > { %p1302_p1 = pneg %p1301_p11 }
  0x5a   : > { %p1307_p5 = pnand %p1305_p3, %p1302_p1 }
  0x5c   : > { %1310 = shalt.err (!%p1307_p5)
}
  0x5d   : > { %s1311_s15 = scalar_lea.vmem %s1650_s18, 1024  ;;  %p1319_p0 = scmp.lt.s32.totalorder %s1650_s18, %s1650_s18 }
  0x5e   : > { %p1312_p8 = scmp.ne.s32.totalorder %s1650_s18, %s1311_s15  ;;  %p1320_p2 = scmp.lt.s32.totalorder %s1311_s15, %s1311_s15 }
  0x60   : > { %p1314_p12 = pnand %p1312_p8, %p1272_p10  ;;  %p1321_p4 = por %p1320_p2, %p1319_p0 }
  0x62   : > { %p1315_p13 = pneg %p1314_p12 }
  0x64   : > { %p1322_p6 = pnand %p1321_p4, %p1315_p13 }
  0x66   : > { %1325 = shalt.err (!%p1322_p6)
}
  0x67   : > { %1109 = dma.hbm_to_vmem [thread:$0]  (!%p1646_p7), %s1951_s6, 1024, %s1650_s18, [#allocation10], %s1931_s19, %s1931_s19, %s1932_s21  }
  0x68   : > { %s42_s11 = sadd.s32 1, %s1476_s26  ;;  %s45_s16 = sadd.s32 1, %s1480_s27 }
  0x69   : > { %p43_p10 = scmp.ge.s32.totalorder %s42_s11, 2  ;;  %s49_s0 = sld [smem:[#allocation4 + %s1480_s27]] }
  0x6a   : > { %p67_p11 = scmp.ne.s32.totalorder %s1464_s23, %s1460_s22  ;;  %p68_p1 = scmp.eq.s32.totalorder %s1484_s28, 0 }
  0x6b   : > { %s1980_s16 = smov (!%p43_p10, %s45_s16), %s1480_s27  ;;  %s1982_s11 = smov (%p43_p10, %s42_s11), 0 }
  0x6c   : > { %1952 = sst [smem:[#allocation23_spill]] %s1982_s11  ;;  %p47_p9 = scmp.ge.s32.totalorder %s1980_s16, 2 }
  0x6d   : > { %s204_s30 = sadd.s32 1, %s1452_s20  ;;  %p1721_p3 = por %p68_p1, %p67_p11 }
  0x6e   : > { %s1984_s16 = smov (%p47_p9, %s1980_s16), 0  ;;  %p1122_p8 = scmp.lt.s32.totalorder %s1484_s28, 4 }
  0x6f   : > { %s50_s12 = sadd.s32 %s1476_s26, %s49_s0  ;;  %1953 = sst [smem:[#allocation24_spill]] %s1984_s16 }
  0x70   : > { %p51_p7 = scmp.lt.s32.totalorder %s50_s12, 2  ;;  %s53_s18 = sld [smem:[#allocation4 + %s1984_s16]] }
  0x71   : > { %s201_s29 = ssub.s32 %s1480_s27, %s1984_s16  ;;  %s60_s8 = sadd.s32 1, %s1464_s23 }
  0x72   : > { %p202_p5 = scmp.eq.s32.totalorder %s201_s29, 0  ;;  %s1986_s12 = smov (!%p51_p7, %s50_s12), 2 }
  0x73   : > { %s1093_s15 = scalar_select %p1721_p3, [#allocation4], [#allocation13] }
  0x74   : > { %s1727_s17 = scalar_select %p202_p5, %s1452_s20, %s204_s30  }
  0x75   : > { %p1737_p13 = pnand %p1122_p8, %p1721_p3  ;;  %s1990_s15 = smov (!%p1122_p8, %s1093_s15), [#allocation14] }
  0x76   : > { %s54_s7 = sadd.s32 %s53_s18, %s1982_s11  ;;  %s273_s30 = sand.u32 1, %s1464_s23  }
  0x77   : > { %p55_p12 = scmp.lt.s32.totalorder %s54_s7, 2  ;;  %s942_s4 = sshll.u32 %s273_s30, 6 }
  0x78   : > { %s1094_s19 = scalar_select %p1721_p3, %s1480_s27, 0 }
  0x79   : > { %s1988_s7 = smov (!%p55_p12, %s54_s7), 2  ;;  %s277_s16 = scalar_lea.vmem [#allocation6], %s942_s4 }
  0x7a   : > { %s57_s29 = ssub.s32 %s1986_s12, %s1988_s7  ;;  %s1992_s19 = smov (!%p1122_p8, %s1094_s19), 0 }
  0x7b   : > { %p58_p0 = scmp.eq.s32.totalorder %s57_s29, 0  ;;  %s278_s21 = sld [smem:[%s1990_s15 + %s1992_s19]] }
  0x7c   : > { %s288_s11 = sshll.u32 %s277_s16, 4  ;;  %p1328_p6 = pneg %p1737_p13  ;;  %s1753_s11 = int_to_ptr.vmem [resolvable:$true] %s288_s11 }
  0x7d   : > { %s1750_s18 = scalar_select %p58_p0, %s1464_s23, %s60_s8  }
  0x7e   : > { %s1760_s8 = scalar_lea.sflag [#allocation7], %s273_s30  ;;  %s1331_s27 = scalar_lea.hbm %s1913_s2, 3072 }
  0x81   : > { %s279_s6 = sadd.s32 %s1476_s26, %s278_s21 }
  0x82   : > { %p280_p2 = scmp.lt.s32.totalorder %s279_s6, 2 }
  0x84   : > { %s1994_s6 = smov (!%p280_p2, %s279_s6), 2 }
  0x85   : > { %s997_s14 = sshll.u32 %s1994_s6, 10 }
  0x86   : > { %s1758_s7 = scalar_lea.hbm %s1913_s2, %s997_s14 }
  0x87   : > { %s1326_s19 = scalar_lea.hbm %s1758_s7, 1024  ;;  %p1332_p11 = scmp.lt.u32.totalorder %s1758_s7, %s1913_s2 }
  0x88   : > { %p1327_p4 = scmp.ne.s32.totalorder %s1758_s7, %s1326_s19  ;;  %p1333_p1 = scmp.lt.u32.totalorder %s1331_s27, %s1326_s19 }
  0x89   : > { %p1335_p3 = scmp.lt.u32.totalorder %s1326_s19, %s1758_s7 }
  0x8a   : > { %p1329_p10 = pnand %p1328_p6, %p1327_p4  ;;  %p1334_p7 = por %p1333_p1, %p1332_p11 }
  0x8c   : > { %p1330_p9 = pneg %p1329_p10  ;;  %p1336_p5 = por %p1335_p3, %p1334_p7 }
  0x8e   : > { %p1337_p8 = pnand %p1336_p5, %p1330_p9 }
  0x90   : > { %1340 = shalt.err (!%p1337_p8)
}
  0x91   : > { %s1341_s15 = scalar_lea.vmem %s1753_s11, 1024  ;;  %s1492_s29 = smov [#allocation6]  }
  0x92   : > { %p1342_p12 = scmp.ne.s32.totalorder %s1753_s11, %s1341_s15  ;;  %s1346_s30 = sshll.u32 %s1492_s29, 4  ;;  %s1347_s30 = int_to_ptr.vmem [resolvable:$false] %s1346_s30 }
  0x93   : > { %s1348_s14 = scalar_lea.vmem %s1347_s30, 2048  ;;  %p1349_p4 = scmp.lt.s32.totalorder %s1753_s11, %s1347_s30 }
  0x94   : > { %p1344_p0 = pnand %p1342_p12, %p1328_p6  ;;  %p1350_p10 = scmp.lt.s32.totalorder %s1348_s14, %s1341_s15 }
  0x96   : > { %p1345_p2 = pneg %p1344_p0  ;;  %p1351_p11 = por %p1350_p10, %p1349_p4 }
  0x98   : > { %p1352_p1 = pnand %p1351_p11, %p1345_p2 }
  0x9a   : > { %1355 = shalt.err (!%p1352_p1)
}
  0x9b   : > { %s1956_s12 = smov 4   ;;  %s1957_s19 = smov 64  }
  0x9c   : > { %1115 = dma.hbm_to_vmem [thread:$0]  (!%p1737_p13), %s1758_s7, 1024, %s1753_s11, %s1760_s8, %s1957_s19, %s1957_s19, %s1956_s12  }
  0x9d   : > { %p1958_p6 = scmp.ne.s32.totalorder %s1948_s13, 0 }
  0x9e   : > { %s316_s4 = sand.u32 (!%p1958_p6), 1, %s1460_s22   ;;  %p1959_p9 = scmp.ne.s32.totalorder (!%p1958_p6), %s1943_s10, 0 }
  0x9f   : > { %314 = sbr.rel (%p1958_p6) target bundleno = 943 (0x3af), region = 44  ;;  %s946_s6 = sshll.u32 (!%p1958_p6), %s316_s4, 6 }
  0xa0   : > { %s317_s27 = scalar_lea.sflag (!%p1958_p6), [#allocation7], %s316_s4  ;;  %s1794_s21 = scalar_lea.vmem (!%p1958_p6), [#allocation6], %s946_s6 }
  0xa6   : > { %1431 = dma.done.wait (%p1959_p9), %s317_s27, 1024  }
  0xa7   : > { %1433 = vsyncadd (%p1959_p9), %s317_s27, 4294966272  ;;  %p1960_p7 = scmp.ne.s32.totalorder %s1942_s9, 0 }
  0xa9   : > { %1435 = dma.done.wait (%p1960_p7), [#allocation10], 2048  }
  0xaa   : > { %1437 = vsyncadd (%p1960_p7), [#allocation10], 4294965248  ;;  %s361_s13 = sand.u32 1, %s1448_s1   ;;  %s953_s11 = sshll.u32 %s1472_s25, 5 }
  0xab   : > { %s369_s0 = sld [smem:[#allocation4 + %s1472_s25]]  ;;  %s949_s7 = sshll.u32 %s361_s13, 5 }
  0xac   : > { %s1816_s15 = scalar_lea.vmem [#allocation12], %s949_s7  ;;  %p954_p3 = scmp.ne.s32.totalorder %s1468_s24, 0 }
  0xad   : > { %v1493_v0 = vmov (!%p954_p3), 0.0  }
  0xae   : > { %387 = vst [vmem:[#allocation2] sm:$0xff] (!%p954_p3), %v1493_v0  ;;  %388 = vst [vmem:[#allocation2 + $0x8] sm:$0xff] (!%p954_p3), %v1493_v0 }
  0xaf   : > { %389 = vst [vmem:[#allocation2 + $0x10] sm:$0xff] (!%p954_p3), %v1493_v0  ;;  %390 = vst [vmem:[#allocation2 + $0x18] sm:$0xff] (!%p954_p3), %v1493_v0 }
  0xb0   : > { %386 = sbr.rel (%p954_p3) target bundleno = 183 (0xb7), region = 60 }
  0xb1   : > { %s370_s8 = sadd.s32 %s1468_s24, %s369_s0 }
  0xb2   : > { %p371_p13 = scmp.lt.s32.totalorder %s370_s8, 2 }
  0xb4   : > { %s1996_s8 = smov (!%p371_p13, %s370_s8), 2 }
  0xb5   : > { %s1998_s8 = smov (!%p371_p13, %s1996_s8), 2 }
  0xb6   : > { %s375_s9 = scalar_lea.vmem %s1914_s3, %s1998_s8 }
  0xb7 PF: > { %s391_s29 = sld [smem:[#allocation5 + %s1472_s25]] }
  0xbd   : > { %p955_p5 = scmp.ge.s32.totalorder %s1468_s24, %s391_s29 }
  0xbe   : > { %v1224_v1 = vld [vmem:[%s1794_s21] sm:$0xff] (!%p955_p5)   ;;  %v397_v2 = vlaneseq (!%p955_p5)  ;;  %v1225_v3 = vld [vmem:[%s1794_s21 + $0x8] sm:$0xff] (!%p955_p5)   ;;  %v402_v5 = vstv (!%p955_p5), %s953_s11  ;;  %v1226_v6 = vld [vmem:[%s1794_s21 + $0x10] sm:$0xff] (!%p955_p5)   ;;  %v1494_v12 = vmov (!%p955_p5), 1.0|1.0  }
  0xbf   : > { %395 = sbr.rel (%p955_p5) target bundleno = 441 (0x1b9), region = 64  ;;  %1029 = vmatprep.subr.bf16.mxu0 (!%p955_p5), %v1224_v1  ;;  %v1227_v10 = vld [vmem:[%s1794_s21 + $0x18] sm:$0xff] (!%p955_p5)   ;;  %v1228_v13 = vld [vmem:[%s1794_s21 + $0x20] sm:$0xff] (!%p955_p5)   ;;  %v1229_v14 = vld [vmem:[%s1794_s21 + $0x28] sm:$0xff] (!%p955_p5)  }
  0xc0   : > { %v398_v4 = vshrl.u32 (!%p955_p5), %v397_v2, 7  ;;  %1030 = vmatpush3.bf16.msra.mxu0 (!%p955_p5), %v1224_v1  ;;  %v956_v11 = vld [vmem:[%s375_s9] ss:$0 sm:$0xff] (!%p955_p5)  ;;  %v1230_v15 = vld [vmem:[%s1794_s21 + $0x30] sm:$0xff] (!%p955_p5)   ;;  %v425_v22 = vld [vmem:[#allocation2] sm:$0xff] (!%p955_p5) }
  0xc1   : > { %1031 = vmatprep.subr.bf16.mxu0 (!%p955_p5), %v1225_v3  ;;  %v1231_v18 = vld [vmem:[%s1794_s21 + $0x38] sm:$0xff] (!%p955_p5)   ;;  %v427_v21 = vld [vmem:[#allocation2 + $0x10] sm:$0xff] (!%p955_p5)  ;;  %v426_v27 = vld [vmem:[#allocation2 + $0x8] sm:$0xff] (!%p955_p5) }
  0xc2   : > { %v399_v7 = vadd.s32 (!%p955_p5), 8, %v398_v4  ;;  %v403_v8 = vadd.s32 (!%p955_p5), %v402_v5, %v398_v4  ;;  %v400_v16 = vadd.s32 (!%p955_p5), 16, %v398_v4  ;;  %v401_v17 = vadd.s32 (!%p955_p5), 24, %v398_v4  ;;  %v428_v24 = vld [vmem:[#allocation2 + $0x18] sm:$0xff] (!%p955_p5) }
  0xc4   : > { %v404_v9 = vadd.s32 (!%p955_p5), %v402_v5, %v399_v7  ;;  %1032 = vmatpush3.bf16.msra.mxu0 (!%p955_p5), %v1225_v3  ;;  %vm411_vm0 = vcmp.eq.s32.totalorder (!%p955_p5), %v403_v8, %v956_v11  ;;  %v405_v19 = vadd.s32 (!%p955_p5), %v402_v5, %v400_v16  ;;  %v406_v20 = vadd.s32 (!%p955_p5), %v402_v5, %v401_v17 }
  0xc5   : > { %1033 = vmatprep.subr.bf16.mxu0 (!%p955_p5), %v1226_v6 }
  0xc6   : > { %vm412_vm1 = vcmp.eq.s32.totalorder %v404_v9, %v956_v11  ;;  %vm413_vm3 = vcmp.eq.s32.totalorder %v405_v19, %v956_v11  ;;  %vm414_vm4 = vcmp.eq.s32.totalorder %v406_v20, %v956_v11 }
  0xc7   : > { %vm969_vm2 = vmpackc.low %vm412_vm1, %vm411_vm0 }
  0xc8   : > { %1034 = vmatpush3.bf16.msra.mxu0 %v1226_v6  ;;  %1045 = vmatprep.mubr.msk.bf16.mxu0 %vm969_vm2, %v1494_v12  ;;  %vm971_vm5 = vmpackc.low %vm414_vm4, %vm413_vm3 }
  0xc9   : > { %1035 = vmatprep.subr.bf16.mxu0 %v1227_v10 }
  0xcc   : > { %1036 = vmatpush3.bf16.msra.mxu0 %v1227_v10 }
  0xcd   : > { %1037 = vmatprep.subr.bf16.mxu0 %v1228_v13 }
  0xd0   : > { %1038 = vmatpush3.bf16.msra.mxu0 %v1228_v13 }
  0xd1   : > { %1039 = vmatprep.subr.bf16.mxu0 %v1229_v14 }
  0xd4   : > { %1040 = vmatpush3.bf16.msra.mxu0 %v1229_v14 }
  0xd5   : > { %1041 = vmatprep.subr.bf16.mxu0 %v1230_v15 }
  0xd8   : > { %1042 = vmatpush3.bf16.msra.mxu0 %v1230_v15 }
  0xd9   : > { %1043 = vmatprep.subr.bf16.mxu0 %v1231_v18 }
  0xdc   : > { %1044 = vmatpush3.bf16.msra.mxu0 %v1231_v18 }
  0xdf   : > { %1046 = vmatmul.mubr.msk.bf16.vlgmr.msra.gmra.mrb[0].mxu0 %vm971_vm5, %v1494_v12 }
 0x1b2   : > { %v1047_v23 = vpop.f32.mrb[0].mxu0 }
 0x1b3   : > { %v544_v25 = vadd.f32 %v1047_v23, %v427_v21  ;;  %v527_v26 = vpop.f32.mrb[1].mxu0 }
 0x1b4   : > { %v542_v28 = vadd.f32 %v527_v26, %v425_v22  ;;  %v1048_v29 = vpop.f32.mrb[2].mxu0 }
 0x1b5   : > { %548 = vst [vmem:[#allocation2 + $0x10] sm:$0xff] %v544_v25  ;;  %v545_v30 = vadd.f32 %v1048_v29, %v428_v24  ;;  %v530_v31 = vpop.f32.mrb[3].mxu0 }
 0x1b6   : > { %546 = vst [vmem:[#allocation2] sm:$0xff] %v542_v28  ;;  %v543_v32 = vadd.f32 %v530_v31, %v426_v27 }
 0x1b7   : > { %549 = vst [vmem:[#allocation2 + $0x18] sm:$0xff] %v545_v30 }
 0x1b8   : > { %547 = vst [vmem:[#allocation2 + $0x8] sm:$0xff] %v543_v32 }
 0x1b9 PF: > { %p973_p8 = scmp.ne.s32.totalorder %s1468_s24, 1 }
 0x1ba   : > { %v1232_v33 = vld [vmem:[#allocation9] sm:$0xff] (!%p973_p8)   ;;  %v1233_v34 = vld [vmem:[#allocation9 + $0x8] sm:$0xff] (!%p973_p8)   ;;  %v1234_v35 = vld [vmem:[#allocation9 + $0x10] sm:$0xff] (!%p973_p8)   ;;  %s1961_s19 = sld [smem:[#allocation27_spill]] (!%p973_p8) }
 0x1bb   : > { %553 = sbr.rel (%p973_p8) target bundleno = 915 (0x393), region = 68  ;;  %1049 = vmatprep.subr.bf16.mxu0 (!%p973_p8), %v1232_v33  ;;  %v1235_v36 = vld [vmem:[#allocation9 + $0x18] sm:$0xff] (!%p973_p8)   ;;  %v1240_v40 = vld [vmem:[#allocation11] sm:$0xff] (!%p973_p8)   ;;  %v1241_v41 = vld [vmem:[#allocation11 + $0x8] sm:$0xff] (!%p973_p8)  }
 0x1bc   : > { %1050 = vmatpush3.bf16.msra.mxu0 (!%p973_p8), %v1232_v33  ;;  %v1236_v42 = vld [vmem:[#allocation9 + $0x20] sm:$0xff] (!%p973_p8)   ;;  %1069 = vmatprep.subr.bf16.mxu1 (!%p973_p8), %v1240_v40  ;;  %v1242_v43 = vld [vmem:[#allocation11 + $0x10] sm:$0xff] (!%p973_p8)   ;;  %v1237_v44 = vld [vmem:[#allocation9 + $0x28] sm:$0xff] (!%p973_p8)  }
 0x1bd   : > { %1051 = vmatprep.subr.bf16.mxu0 (!%p973_p8), %v1233_v34  ;;  %v554_v37 = vld [vmem:[#allocation2] sm:$0xff] (!%p973_p8)  ;;  %1070 = vmatpush3.bf16.msra.mxu1 (!%p973_p8), %v1240_v40  ;;  %v1243_v45 = vld [vmem:[#allocation11 + $0x18] sm:$0xff] (!%p973_p8)   ;;  %v1238_v46 = vld [vmem:[#allocation9 + $0x30] sm:$0xff] (!%p973_p8)  }
 0x1be   : > { %1071 = vmatprep.subr.bf16.mxu1 (!%p973_p8), %v1241_v41  ;;  %v1244_v47 = vld [vmem:[#allocation11 + $0x20] sm:$0xff] (!%p973_p8)   ;;  %v1239_v48 = vld [vmem:[#allocation9 + $0x38] sm:$0xff] (!%p973_p8)   ;;  %v1245_v49 = vld [vmem:[#allocation11 + $0x28] sm:$0xff] (!%p973_p8)  }
 0x1bf   : > { %v555_v38 = vld [vmem:[#allocation2 + $0x8] sm:$0xff] (!%p973_p8)  ;;  %v556_v50 = vld [vmem:[#allocation2 + $0x10] sm:$0xff] (!%p973_p8)  ;;  %v557_v51 = vld [vmem:[#allocation2 + $0x18] sm:$0xff] (!%p973_p8) }
 0x1c0   : > { %1052 = vmatpush3.bf16.msra.mxu0 (!%p973_p8), %v1233_v34  ;;  %v558_v39 = vpack.c.bf16 (!%p973_p8), %v555_v38, %v554_v37  ;;  %v559_v52 = vpack.c.bf16 (!%p973_p8), %v557_v51, %v556_v50  ;;  %v1246_v53 = vld [vmem:[#allocation11 + $0x30] sm:$0xff] (!%p973_p8)   ;;  %v1247_v54 = vld [vmem:[#allocation11 + $0x38] sm:$0xff] (!%p973_p8)  }
 0x1c1   : > { %1053 = vmatprep.subr.bf16.mxu0 (!%p973_p8), %v1234_v35  ;;  %1072 = vmatpush3.bf16.msra.mxu1 (!%p973_p8), %v1241_v41  ;;  %v974_v55 = vld [vmem:[%s1916_s5] ss:$0 sm:$0xff] (!%p973_p8) }
 0x1c2   : > { %1065 = vmatprep.mubr.bf16.mxu0 %v558_v39  ;;  %1073 = vmatprep.subr.bf16.mxu1 %v1242_v43  ;;  %v983_v6 = vld [vmem:[%s1961_s19] ss:$0 sm:$0xff] }
 0x1c4   : > { %1054 = vmatpush3.bf16.msra.mxu0 %v1234_v35 }
 0x1c5   : > { %1055 = vmatprep.subr.bf16.mxu0 %v1235_v36  ;;  %1074 = vmatpush3.bf16.msra.mxu1 %v1242_v43 }
 0x1c6   : > { %1075 = vmatprep.subr.bf16.mxu1 %v1243_v45 }
 0x1c8   : > { %1056 = vmatpush3.bf16.msra.mxu0 %v1235_v36 }
 0x1c9   : > { %1057 = vmatprep.subr.bf16.mxu0 %v1236_v42  ;;  %1076 = vmatpush3.bf16.msra.mxu1 %v1243_v45 }
 0x1ca   : > { %1077 = vmatprep.subr.bf16.mxu1 %v1244_v47 }
 0x1cc   : > { %1058 = vmatpush3.bf16.msra.mxu0 %v1236_v42 }
 0x1cd   : > { %1059 = vmatprep.subr.bf16.mxu0 %v1237_v44  ;;  %1078 = vmatpush3.bf16.msra.mxu1 %v1244_v47 }
 0x1ce   : > { %1079 = vmatprep.subr.bf16.mxu1 %v1245_v49 }
 0x1d0   : > { %1060 = vmatpush3.bf16.msra.mxu0 %v1237_v44 }
 0x1d1   : > { %1061 = vmatprep.subr.bf16.mxu0 %v1238_v46  ;;  %1080 = vmatpush3.bf16.msra.mxu1 %v1245_v49 }
 0x1d2   : > { %1081 = vmatprep.subr.bf16.mxu1 %v1246_v53 }
 0x1d4   : > { %1062 = vmatpush3.bf16.msra.mxu0 %v1238_v46 }
 0x1d5   : > { %1063 = vmatprep.subr.bf16.mxu0 %v1239_v48  ;;  %1082 = vmatpush3.bf16.msra.mxu1 %v1246_v53 }
 0x1d6   : > { %1083 = vmatprep.subr.bf16.mxu1 %v1247_v54 }
 0x1d8   : > { %1064 = vmatpush3.bf16.msra.mxu0 %v1239_v48 }
 0x1d9   : > { %1084 = vmatpush3.bf16.msra.mxu1 %v1247_v54 }
 0x1db   : > { %1066 = vmatmul.mubr.bf16.vlgmr.msra.gmra.mrb[0].mxu0 %v559_v52 }
 0x2ae   : > { %v1067_v56 = vpop.f32.mrb[0].mxu0 }
 0x2af   : > { %v674_v57 = vadd.f32 %v1067_v56, %v974_v55  ;;  %v665_v58 = vpop.f32.mrb[1].mxu0 }
 0x2b0   : > { %v666_v59 = vadd.f32 %v974_v55, %v665_v58  ;;  %v1068_v60 = vpop.f32.mrb[2].mxu0 }
 0x2b1   : > { %v677_v61 = vadd.f32 %v1068_v60, %v974_v55  ;;  %v668_v62 = vpop.f32.mrb[3].mxu0  ;;  %v682_v0 = vmax.f32 %v674_v57, 0.0 }
 0x2b2   : > { %v669_v63 = vadd.f32 %v974_v55, %v668_v62  ;;  %v680_v2 = vmax.f32 %v666_v59, 0.0 }
 0x2b3   : > { %v683_v1 = vmax.f32 %v677_v61, 0.0 }
 0x2b4   : > { %v681_v3 = vmax.f32 %v669_v63, 0.0 }
 0x2b5   : > { %v685_v4 = vpack.c.bf16 %v683_v1, %v682_v0 }
 0x2b6   : > { %v684_v5 = vpack.c.bf16 %v681_v3, %v680_v2 }
 0x2b8   : > { %1085 = vmatprep.mubr.bf16.mxu1 %v684_v5 }
 0x2b9   : > { %1086 = vmatmul.mubr.bf16.vlgmr.msra.gmra.mrb[0].mxu1 %v685_v4 }
 0x38c   : > { %v1087_v7 = vpop.f32.mrb[0].mxu1 }
 0x38d   : > { %v800_v8 = vadd.f32 %v1087_v7, %v983_v6  ;;  %v791_v9 = vpop.f32.mrb[1].mxu1 }
 0x38e   : > { %v792_v10 = vadd.f32 %v983_v6, %v791_v9  ;;  %v1088_v11 = vpop.f32.mrb[2].mxu1 }
 0x38f   : > { %808 = vst [vmem:[%s1816_s15 + $0x10] sm:$0xff] %v800_v8  ;;  %v803_v12 = vadd.f32 %v1088_v11, %v983_v6  ;;  %v794_v13 = vpop.f32.mrb[3].mxu1 }
 0x390   : > { %806 = vst [vmem:[%s1816_s15] sm:$0xff] %v792_v10  ;;  %v795_v14 = vadd.f32 %v983_v6, %v794_v13 }
 0x391   : > { %809 = vst [vmem:[%s1816_s15 + $0x18] sm:$0xff] %v803_v12 }
 0x392   : > { %807 = vst [vmem:[%s1816_s15 + $0x8] sm:$0xff] %v795_v14 }
 0x393 PF: > { %s1962_s4 = sld [smem:[#allocation21_spill]]  ;;  %s998_s6 = sshll.u32 %s1472_s25, 9 }
 0x394   : > { %s1963_s11 = sld [smem:[#allocation28_spill]]  ;;  %s824_s7 = sshll.u32 %s1816_s15, 4  ;;  %s1847_s7 = int_to_ptr.vmem [resolvable:$true] %s824_s7 }
 0x395   : > { %s1851_s8 = scalar_lea.sflag [#allocation8], %s361_s13  ;;  %s1356_s10 = scalar_lea.vmem %s1847_s7, 512 }
 0x396   : > { %p1357_p12 = scmp.ne.s32.totalorder %s1847_s7, %s1356_s10  ;;  %s1495_s25 = smov [#allocation12]  }
 0x397   : > { %s1360_s16 = sshll.u32 %s1495_s25, 4  ;;  %s1361_s16 = int_to_ptr.vmem [resolvable:$false] %s1360_s16 }
 0x398   : > { %s1362_s9 = scalar_lea.vmem %s1361_s16, 1024  ;;  %p1363_p10 = scmp.lt.s32.totalorder %s1847_s7, %s1361_s16 }
 0x399   : > { %p1964_p0 = scmp.ne.s32.totalorder %s1962_s4, 0  ;;  %p1364_p11 = scmp.lt.s32.totalorder %s1362_s9, %s1356_s10 }
 0x39a   : > { %s1844_s0 = scalar_lea.hbm %s1963_s11, %s998_s6 }
 0x39b   : > { %p1358_p2 = pnand %p1357_p12, %p1964_p0  ;;  %p1365_p1 = por %p1364_p11, %p1363_p10 }
 0x39d   : > { %p1359_p4 = pneg %p1358_p2 }
 0x39f   : > { %p1366_p6 = pnand %p1365_p1, %p1359_p4 }
 0x3a1   : > { %1369 = shalt.err (!%p1366_p6)
}
 0x3a2   : > { %s1370_s13 = scalar_lea.hbm %s1844_s0, 512  ;;  %s1374_s24 = scalar_lea.hbm %s1963_s11, 1024 }
 0x3a3   : > { %p1371_p9 = scmp.ne.s32.totalorder %s1844_s0, %s1370_s13  ;;  %p1375_p3 = scmp.lt.u32.totalorder %s1844_s0, %s1963_s11 }
 0x3a4   : > { %p1376_p5 = scmp.lt.u32.totalorder %s1374_s24, %s1370_s13  ;;  %p1378_p12 = scmp.lt.u32.totalorder %s1370_s13, %s1844_s0 }
 0x3a5   : > { %p1372_p7 = pnand %p1371_p9, %p1964_p0 }
 0x3a6   : > { %p1377_p8 = por %p1376_p5, %p1375_p3 }
 0x3a7   : > { %p1373_p13 = pneg %p1372_p7 }
 0x3a8   : > { %p1379_p2 = por %p1378_p12, %p1377_p8 }
 0x3aa   : > { %p1380_p4 = pnand %p1379_p2, %p1373_p13 }
 0x3ac   : > { %1383 = shalt.err (!%p1380_p4)
}
 0x3ad   : > { %s1496_s12 = smov 128   ;;  %s1497_s19 = smov 8  }
 0x3ae   : > { %1101 = dma.vmem_to_hbm [thread:$0]  (%p1964_p0), %s1847_s7, 512, %s1844_s0, %s1851_s8, %s1496_s12, %s1496_s12, %s1497_s19  }
 0x3af PF: > { %s1965_s6 = sld [smem:[#allocation19_spill]]  ;;  %s1966_s27 = sld [smem:[#allocation22_spill]] }
 0x3b0   : > { %p1125_p10 = scmp.ge.s32.totalorder %s1484_s28, 2 }
 0x3b5   : > { %s839_s21 = sand.u32 1, %s1965_s6   ;;  %p1967_p11 = scmp.ne.s32.totalorder %s1966_s27, 0 }
 0x3b6   : > { %s840_s10 = scalar_lea.sflag [#allocation8], %s839_s21 }
 0x3b7   : > { %p1117_p1 = pnand %p1125_p10, %p1967_p11 }
 0x3b9   : > { %1439 = dma.done.wait (!%p1117_p1), %s840_s10, 512  }
 0x3ba   : > { %1441 = vsyncadd (!%p1117_p1), %s840_s10, 4294966784  ;;  %s33_s28 = sadd.s32 1, %s1484_s28   ;;  %s1968_s25 = sld [smem:[#allocation20_spill]] }
 0x3bb   : > { %p30_p6 = scmp.ge.s32.totalorder %s33_s28, 6   ;;  %s1969_s4 = sld [smem:[#allocation23_spill]] }
 0x3bc   : > { %s1970_s27 = sld [smem:[#allocation24_spill]]  ;;  %s1971_s0 = smov %s1448_s1 }
 0x3bd   : > { %s1972_s1 = smov %s1452_s20  ;;  %s1973_s20 = smov %s1727_s17 }
 0x3be   : > { %s1974_s21 = smov %s1460_s22  ;;  %s1975_s22 = smov %s1464_s23 }
 0x3bf   : > { %s1976_s23 = smov %s1750_s18  ;;  %s1977_s24 = smov %s1476_s26 }
 0x3c0   :  { %32 = sbr.rel (!%p30_p6) target bundleno = 33 (0x21), region = 112 }
 0x3c1   : > { %s1978_s26 = smov %s1969_s4 }
 0x3c7   :  { %845 = vsyncpa [#allocation7], 1 }
 0x3c8   :  { %847 = vsyncpa [#allocation7 + $0x1], 1 }
 0x3c9   :  { %848 = vsyncpa [#allocation10], 1 }
 0x3ca   :  { %849 = vsyncpa [#allocation8], 1 }
 0x3cb   :  { %851 = vsyncpa [#allocation8 + $0x1], 1 }

</bundles_post_ra>
